<compile_context>
chip_gen: v5e
topology: v5e:2x2
jax: 0.10.0
libtpu: 0.0.40
codegen_flags: <defaults>
</compile_context>

<pallas_src>
import jax
import jax.numpy as jnp
from jax.experimental import pallas as pl
from jax.experimental.pallas import tpu as pltpu


def dueling_dqn_kernel(x_ref, w1_ref, b1_ref, wav_ref, bav_ref, q_ref):
    # x: [TB, S]; w1: [S, H]; b1: [1, H]; wav: [H, A+1]; bav: [1, A+1];
    # q: [TB, A]
    a_dim = q_ref.shape[1]

    x = x_ref[...]

    # Shared trunk: h = relu(x @ W1 + b1)
    h = jnp.dot(x, w1_ref[...], preferred_element_type=jnp.float32) + b1_ref[...]
    h = jnp.maximum(h, 0.0)

    # Fused heads: y[:, :A] = advantage, y[:, A:A+1] = value.
    y = jnp.dot(h, wav_ref[...], preferred_element_type=jnp.float32) + bav_ref[...]
    adv = y[:, :a_dim]
    val = y[:, a_dim:a_dim + 1]

    # Q = adv + (val - mean(adv))  -- single [TB,1] broadcast.
    corr = val - jnp.mean(adv, axis=1, keepdims=True)
    q_ref[...] = (adv + corr).astype(q_ref.dtype)


def prepare_params(params):
    """One-time prep: transpose PyTorch [out,in] weights to [in,out] and fuse
    the A/V heads into a single [H, A+1] weight + [1, A+1] bias."""
    w1 = params["fc1_w"].T                              # [S, H]
    b1 = params["fc1_b"].reshape(1, -1)                 # [1, H]
    wav = jnp.concatenate([params["fc_A_w"].T,          # [H, A]
                           params["fc_V_w"].T], axis=1)  # [H, A+1]
    bav = jnp.concatenate([params["fc_A_b"],
                           params["fc_V_b"]]).reshape(1, -1)  # [1, A+1]
    return {"w1": w1, "b1": b1, "wav": wav, "bav": bav}


def dueling_dqn_forward(x, prepped, *, block_b=512):
    """x: [B, state_dim] float32. prepped: output of prepare_params (done once)."""
    B, S = x.shape
    w1, b1, wav, bav = prepped["w1"], prepped["b1"], prepped["wav"], prepped["bav"]
    H = w1.shape[1]
    A = wav.shape[1] - 1

    # Batch tile: multiple of 8 (sublane), capped at block_b.
    # (On v6e/v7x, block_b >= 256 keeps the MXU M-dimension filled; tiles are
    #  tiny — ~2*(TB*S + TB*A)*4B double-buffered + <10 KiB of weights — so
    #  even v7x's 64 MiB VMEM has huge headroom.)
    tb = min(block_b, ((B + 7) // 8) * 8)
    Bp = ((B + tb - 1) // tb) * tb
    x_in = jnp.pad(x, ((0, Bp - B), (0, 0))) if Bp != B else x

    q = pl.pallas_call(
        dueling_dqn_kernel,
        out_shape=jax.ShapeDtypeStruct((Bp, A), jnp.float32),
        grid=(Bp // tb,),
        in_specs=[
            pl.BlockSpec((tb, S), lambda i: (i, 0)),       # x: tiled over batch
            pl.BlockSpec((S, H), lambda i: (0, 0)),        # w1: VMEM-resident
            pl.BlockSpec((1, H), lambda i: (0, 0)),        # b1
            pl.BlockSpec((H, A + 1), lambda i: (0, 0)),    # fused A/V weight
            pl.BlockSpec((1, A + 1), lambda i: (0, 0)),    # fused A/V bias
        ],
        out_specs=pl.BlockSpec((tb, A), lambda i: (i, 0)),
        compiler_params=pltpu.CompilerParams(
            dimension_semantics=("parallel",)),
    )(x_in, w1, b1, wav, bav)

    return q[:B] if Bp != B else q


def init_params(state_dim, hidden_dim, action_dim):
    """Deterministic synthetic init in PyTorch nn.Linear param shapes."""
    key = jax.random.PRNGKey(0)
    k1, k2, k3, k4, k5, k6 = jax.random.split(key, 6)

    def uniform(k, shape, fan_in):
        bound = 1.0 / jnp.sqrt(fan_in)
        return jax.random.uniform(k, shape, jnp.float32, -bound, bound)

    return {
        "fc1_w": uniform(k1, (hidden_dim, state_dim), state_dim),
        "fc1_b": uniform(k2, (hidden_dim,), state_dim),
        "fc_A_w": uniform(k3, (action_dim, hidden_dim), hidden_dim),
        "fc_A_b": uniform(k4, (action_dim,), hidden_dim),
        "fc_V_w": uniform(k5, (1, hidden_dim), hidden_dim),
        "fc_V_b": uniform(k6, (1,), hidden_dim),
    }


def reference_forward(x, params):
    h = jnp.maximum(x @ params["fc1_w"].T + params["fc1_b"], 0.0)
    adv = h @ params["fc_A_w"].T + params["fc_A_b"]
    val = h @ params["fc_V_w"].T + params["fc_V_b"]
    return val + adv - adv.mean(axis=1, keepdims=True)


if __name__ == "__main__":
    state_dim, hidden_dim, action_dim = 4, 32, 4

    params = init_params(state_dim, hidden_dim, action_dim)
    prepped = prepare_params(params)   # one-time, outside the hot path

    # Small-batch run (matches original usage).
    x_small = jax.random.normal(jax.random.PRNGKey(0), (8, state_dim), jnp.float32)
    q_small = jax.block_until_ready(dueling_dqn_forward(x_small, prepped))
    q_small_ref = reference_forward(x_small, params)
    assert q_small.shape == (8, action_dim)
    assert jnp.allclose(q_small, q_small_ref, atol=1e-5, rtol=1e-5), \
        "small-batch mismatch vs reference"

    # Larger batch: exercises the batch grid (2 tiles of 512) + pad/slice path.
    x_big = jax.random.normal(jax.random.PRNGKey(1), (1000, state_dim), jnp.float32)
    q_big = jax.block_until_ready(dueling_dqn_forward(x_big, prepped))
    q_big_ref = reference_forward(x_big, params)
    assert q_big.shape == (1000, action_dim)
    assert jnp.allclose(q_big, q_big_ref, atol=1e-5, rtol=1e-5), \
        "large-batch mismatch vs reference"

    print("KERNEL_OK")
</pallas_src>

<mosaic_0001>
module attributes {stable_mosaic.version = 11 : i64} {
  func.func @dueling_dqn_kernel(%arg0: i32, %arg1: memref<8x4xf32, #tpu.memory_space<vmem>>, %arg2: memref<4x32xf32, #tpu.memory_space<vmem>>, %arg3: memref<1x32xf32, #tpu.memory_space<vmem>>, %arg4: memref<32x5xf32, #tpu.memory_space<vmem>>, %arg5: memref<1x5xf32, #tpu.memory_space<vmem>>, %arg6: memref<8x4xf32, #tpu.memory_space<vmem>>) attributes {dimension_semantics = [#tpu.dimension_semantics<parallel>], iteration_bounds = array<i64: 1>, scalar_prefetch = 0 : i64, scratch_operands = 0 : i64, tpu.core_type = #tpu.core_type<tc>, window_params = [{transform_indices = @transform_0, window_bounds = array<i64: 8, 4>}, {pipeline_mode = #tpu.pipeline_mode<synchronous>, transform_indices = @transform_1, window_bounds = array<i64: 4, 32>}, {pipeline_mode = #tpu.pipeline_mode<synchronous>, transform_indices = @transform_2, window_bounds = array<i64: 1, 32>}, {pipeline_mode = #tpu.pipeline_mode<synchronous>, transform_indices = @transform_3, window_bounds = array<i64: 32, 5>}, {pipeline_mode = #tpu.pipeline_mode<synchronous>, transform_indices = @transform_4, window_bounds = array<i64: 1, 5>}, {transform_indices = @transform_5, window_bounds = array<i64: 8, 4>}]} {
    %c0 = arith.constant 0 : index
    %c0_0 = arith.constant 0 : index
    %0 = vector.load %arg1[%c0, %c0_0] : memref<8x4xf32, #tpu.memory_space<vmem>>, vector<8x4xf32>
    %c0_1 = arith.constant 0 : index
    %c0_2 = arith.constant 0 : index
    %1 = vector.load %arg2[%c0_1, %c0_2] : memref<4x32xf32, #tpu.memory_space<vmem>>, vector<4x32xf32>
    %cst = arith.constant dense<0.000000e+00> : vector<8x32xf32>
    %2 = tpu.matmul %0, %1, %cst {dimension_numbers = #tpu.dot_dimension_numbers<[1], [0], [0], [1], [0, 0, 1, 1], [], []>} : vector<8x4xf32>, vector<4x32xf32>, vector<8x32xf32> -> vector<8x32xf32>
    %c0_3 = arith.constant 0 : index
    %c0_4 = arith.constant 0 : index
    %3 = vector.load %arg3[%c0_3, %c0_4] : memref<1x32xf32, #tpu.memory_space<vmem>>, vector<1x32xf32>
    %4 = vector.broadcast %3 : vector<1x32xf32> to vector<8x32xf32>
    %5 = arith.addf %2, %4 : vector<8x32xf32>
    %cst_5 = arith.constant 0.000000e+00 : f32
    %6 = vector.broadcast %cst_5 : f32 to vector<8x32xf32>
    %7 = arith.maximumf %5, %6 : vector<8x32xf32>
    %c0_6 = arith.constant 0 : index
    %c0_7 = arith.constant 0 : index
    %8 = vector.load %arg4[%c0_6, %c0_7] : memref<32x5xf32, #tpu.memory_space<vmem>>, vector<32x5xf32>
    %cst_8 = arith.constant dense<0.000000e+00> : vector<8x5xf32>
    %9 = tpu.matmul %7, %8, %cst_8 {dimension_numbers = #tpu.dot_dimension_numbers<[1], [0], [0], [1], [0, 0, 1, 1], [], []>} : vector<8x32xf32>, vector<32x5xf32>, vector<8x5xf32> -> vector<8x5xf32>
    %c0_9 = arith.constant 0 : index
    %c0_10 = arith.constant 0 : index
    %10 = vector.load %arg5[%c0_9, %c0_10] : memref<1x5xf32, #tpu.memory_space<vmem>>, vector<1x5xf32>
    %11 = vector.broadcast %10 : vector<1x5xf32> to vector<8x5xf32>
    %12 = arith.addf %9, %11 : vector<8x5xf32>
    %13 = vector.extract_strided_slice %12 {offsets = [0, 0], sizes = [8, 4], strides = [1, 1]} : vector<8x5xf32> to vector<8x4xf32>
    %14 = vector.extract_strided_slice %12 {offsets = [0, 4], sizes = [8, 1], strides = [1, 1]} : vector<8x5xf32> to vector<8x1xf32>
    %cst_11 = arith.constant dense<0.000000e+00> : vector<8xf32>
    %15 = vector.multi_reduction <add>, %13, %cst_11 [1] : vector<8x4xf32> to vector<8xf32>
    %16 = vector.shape_cast %15 : vector<8xf32> to vector<8x1xf32>
    %cst_12 = arith.constant 4.000000e+00 : f32
    %17 = vector.broadcast %cst_12 : f32 to vector<8x1xf32>
    %18 = arith.divf %16, %17 : vector<8x1xf32>
    %19 = arith.subf %14, %18 : vector<8x1xf32>
    %20 = vector.broadcast %19 : vector<8x1xf32> to vector<8x4xf32>
    %21 = arith.addf %13, %20 : vector<8x4xf32>
    %c0_13 = arith.constant 0 : index
    %c0_14 = arith.constant 0 : index
    %22 = vector.load %arg6[%c0_13, %c0_14] : memref<8x4xf32, #tpu.memory_space<vmem>>, vector<8x4xf32>
    tpu.vector_store %arg6[%c0_13, %c0_14], %21 {strides = array<i32>} : memref<8x4xf32, #tpu.memory_space<vmem>>, vector<8x4xf32>,
    return
  }
  func.func @transform_0(%arg0: i32) -> (i32, i32) {
    %c0_i32 = arith.constant 0 : i32
    %c0_i32_0 = arith.constant 0 : i32
    return %arg0, %c0_i32 : i32, i32
  }
  func.func @transform_1(%arg0: i32) -> (i32, i32) {
    %c0_i32 = arith.constant 0 : i32
    %c0_i32_0 = arith.constant 0 : i32
    %c0_i32_1 = arith.constant 0 : i32
    return %c0_i32, %c0_i32_0 : i32, i32
  }
  func.func @transform_2(%arg0: i32) -> (i32, i32) {
    %c0_i32 = arith.constant 0 : i32
    %c0_i32_0 = arith.constant 0 : i32
    %c0_i32_1 = arith.constant 0 : i32
    return %c0_i32, %c0_i32_0 : i32, i32
  }
  func.func @transform_3(%arg0: i32) -> (i32, i32) {
    %c0_i32 = arith.constant 0 : i32
    %c0_i32_0 = arith.constant 0 : i32
    %c0_i32_1 = arith.constant 0 : i32
    return %c0_i32, %c0_i32_0 : i32, i32
  }
  func.func @transform_4(%arg0: i32) -> (i32, i32) {
    %c0_i32 = arith.constant 0 : i32
    %c0_i32_0 = arith.constant 0 : i32
    %c0_i32_1 = arith.constant 0 : i32
    return %c0_i32, %c0_i32_0 : i32, i32
  }
  func.func @transform_5(%arg0: i32) -> (i32, i32) {
    %c0_i32 = arith.constant 0 : i32
    %c0_i32_0 = arith.constant 0 : i32
    return %arg0, %c0_i32 : i32, i32
  }
}

</mosaic_0001>

<bundles_post_ra>
// kernel: tpu_custom_call.1
= control target key start
LH: loop header
LB: loop body
LE: loop exit
PB: predicated region body
PF: predicated region fallthrough
CT: control target
= control target key end

     0   :  { %vm30_vm0 = vcmask 1043456   ;;  %vm26_vm1 = vcmask 31744   ;;  %vm63_vm2 = vcmask 261120   ;;  %v120_v14 = vmov 4   ;;  %s182_s1 = inlined_call_operand.vmem [shape: f32[4,32], index: 1, kind: input, shape index: {}]   ;;  %s183_s0 = inlined_call_operand.vmem [shape: f32[8,4], index: 0, kind: input, shape index: {}]   ;;  %s184_s3 = inlined_call_operand.vmem [shape: f32[32,5], index: 3, kind: input, shape index: {}]   ;;  %s185_s2 = inlined_call_operand.vmem [shape: f32[1,32], index: 2, kind: input, shape index: {}]   ;;  %s186_s4 = inlined_call_operand.vmem [shape: f32[1,5], index: 4, kind: input, shape index: {}]   ;;  %s187_s5 = inlined_call_operand.vmem [shape: f32[8,4], index: 5, kind: output, shape index: {}]  }
   0x1   :  { %v21_v0 = vld [vmem:[%s182_s1] sm:$0xf]  ;;  %v58_v2 = vld [vmem:[%s184_s3 + $0x18] sm:$0xff]  ;;  %v57_v3 = vld [vmem:[%s184_s3 + $0x10] sm:$0xff]  ;;  %115 = vset.pattern.permute.xlu0 %v120_v14  ;;  %v121_v15 = vmov 4.0  }
   0x2   :  { %v20_v1 = vld [vmem:[%s183_s0] sm:$0xff]  ;;  %110 = vmatpush.msk.msra.mxu0 %vm30_vm0, %v21_v0  ;;  %79 = vmatpush.msra.mxu1 %v58_v2  ;;  %v56_v4 = vld [vmem:[%s184_s3 + $0x8] sm:$0xff]  ;;  %118 = vrcp.f32 %v121_v15 }
   0x3   :  { %111 = vmatmul.msk.f32.vlgmr.msra.gmra.mxu0 %vm26_vm1, %v20_v1  ;;  %v55_v5 = vld [vmem:[%s184_s3] sm:$0xff] }
   0x4   :  { %80 = vmatpush.msra.mxu1 %v57_v3  ;;  %v116_v6 = vld [vmem:[%s185_s2] ss:$0 sm:$0xff] }
   0x5   :  { %v117_v10 = vld [vmem:[%s186_s4] ss:$0 sm:$0xff] }
   0x6   :  { %81 = vmatpush.msra.mxu1 %v56_v4 }
   0x8   :  { %82 = vmatpush.msra.mxu1 %v55_v5  ;;  %v119_v16 = vpop.eup %118 }
   0x9   :  { %v91_v17 = vmul.f32 4.0, %v119_v16  ;;  %vm95_vm3 = vweird.f32 %v119_v16 }
   0xb   :  { %v92_v18 = vsub.f32 1.0, %v91_v17 }
   0xd   :  { %v93_v19 = vmul.f32 %v119_v16, %v92_v18 }
   0xf   :  { %v94_v20 = vadd.f32 %v119_v16, %v93_v19 }
  0x11   :  { %v96_v21 = vsel %vm95_vm3, %v119_v16, %v94_v20 }
  0x80   :  { %v51_v7 = vpop.f32.mrf.mxu0 }
  0x81   :  { %v52_v8 = vadd.f32 %v116_v6, %v51_v7 }
  0x83   :  { %v54_v9 = vmax.f32 %v52_v8, 0.0 }
  0x85   :  { %112 = vmatmul.msk.f32.vlgmr.msra.gmra.mxu1 %vm63_vm2, %v54_v9 }
 0x102   :  { %v84_v11 = vpop.f32.mrf.mxu1 }
 0x103   :  { %v85_v12 = vadd.f32 %v117_v10, %v84_v11 }
 0x105   :  { %v87_v13 = vsel %vm26_vm1, %v85_v12, 0.0 }
 0x106   :  { %88 = vadd.xlane.f32.xlu0 %v87_v13 }
 0x179   :  { %v89_v22 = vpop.xlane.xlu0 %88 }
 0x17a   :  { %v97_v23 = vmul.f32 %v96_v21, %v89_v22 }
 0x17c   :  { %v98_v24 = vsub.f32 %v85_v12, %v97_v23 }
 0x17e   :  { %101 = vperm.xlu0 %115, %v98_v24  }
 0x1f0   :  { %v102_v25 = vpop.permute.xlu0 %101 }
 0x1f1   :  { %v104_v26 = vadd.f32 %v102_v25, %v85_v12 }
 0x1f3   :  { %105 = vst.msk [vmem:[%s187_s5] sm:$0xff] %vm26_vm1, %v104_v26 }

</bundles_post_ra>
